<compile_context>
chip_gen: v6e
topology: v6e:2x2x1
jax: 0.10.0
libtpu: 0.0.40
codegen_flags: <defaults>
</compile_context>

<pallas_src>
import functools

import jax
import jax.numpy as jnp
from jax.experimental import pallas as pl
from jax.experimental.pallas import tpu as pltpu

LANE = 128               # TPU lane width
CHUNK_ROWS = 32          # rows of 128 pixels per compute chunk (4 f32 vregs / quantity)
MAX_TILE_ROWS = 1024     # rows per grid-step DMA block (multiple of CHUNK_ROWS)
BLOCK_VMEM_BUDGET = 20 * 1024 * 1024   # budget for the double-buffered input blocks


def _xedice_kernel(preds_ref, tgt_ref, out_ref, *,
                   num_classes, chunk_rows, tile_rows, hw_valid, needs_mask):
    """One grid step: partial sums over a (C, tile_rows, 128) slab of one image."""
    j = pl.program_id(1)

    def fold(acc, x):
        # (rows, 128) -> add into the (8, 128) running vreg accumulator (VPU adds only)
        rows = x.shape[0]
        full = rows // 8
        for s in range(full):
            acc = acc + x[s * 8:(s + 1) * 8, :]
        rem = rows - full * 8
        if rem:
            tail = jnp.concatenate(
                [x[full * 8:, :], jnp.zeros((8 - rem, LANE), x.dtype)], axis=0)
            acc = acc + tail
        return acc

    def process(row_start, rows, carry, lin):
        xe8, in8, p8, t8 = carry
        tgt = tgt_ref[pl.ds(row_start, rows), :]                    # (rows, 128) int32

        def cls(c):
            # per-class (rows, 128) chunk; cast in-kernel so bf16 inputs also work
            return preds_ref[c, pl.ds(row_start, rows), :].astype(jnp.float32)

        # class-axis reductions as short unrolled VPU loops over per-class chunks
        l0 = cls(0)
        m = l0
        for c in range(1, num_classes):
            m = jnp.maximum(m, cls(c))

        esum = jnp.exp(l0 - m)
        picked = jnp.where(tgt == 0, l0, 0.0)
        e1 = None
        for c in range(1, num_classes):
            lc = cls(c)
            ec = jnp.exp(lc - m)
            if c == 1:
                e1 = ec                      # reuse for p1 (no extra exp / slab reload)
            esum = esum + ec
            picked = picked + jnp.where(tgt == c, lc, 0.0)

        lse = m + jnp.log(esum)              # per-pixel logsumexp
        xe = lse - picked                    # per-pixel cross entropy
        p1 = e1 / esum                       # softmax prob of class 1 (exact divide)
        t1 = (tgt == 1).astype(jnp.float32)

        if needs_mask:
            if lin is None:
                lin = (jax.lax.broadcasted_iota(jnp.int32, (rows, LANE), 0) * LANE
                       + jax.lax.broadcasted_iota(jnp.int32, (rows, LANE), 1))
            base = (j * tile_rows + row_start) * LANE
            valid = lin < (hw_valid - base)
            # use where (not multiply): boundary-block garbage rows may be NaN/Inf
            xe = jnp.where(valid, xe, 0.0)
            p1 = jnp.where(valid, p1, 0.0)
            t1 = jnp.where(valid, t1, 0.0)

        return (fold(xe8, xe), fold(in8, p1 * t1), fold(p8, p1), fold(t8, t1))

    zero = jnp.zeros((8, LANE), jnp.float32)
    carry = (zero, zero, zero, zero)

    full_chunks = tile_rows // chunk_rows
    tail_rows = tile_rows - full_chunks * chunk_rows

    # hoist the flat-pixel-index iotas out of the chunk loop (only if masking is needed)
    if needs_mask and full_chunks > 0:
        lin_main = (jax.lax.broadcasted_iota(jnp.int32, (chunk_rows, LANE), 0) * LANE
                    + jax.lax.broadcasted_iota(jnp.int32, (chunk_rows, LANE), 1))
    else:
        lin_main = None

    if full_chunks > 0:
        def body(i, c):
            start = pl.multiple_of(i * chunk_rows, chunk_rows)
            return process(start, chunk_rows, c, lin_main)
        carry = jax.lax.fori_loop(0, full_chunks, body, carry)

    if tail_rows:
        carry = process(full_chunks * chunk_rows, tail_rows, carry, None)

    xe8, in8, p8, t8 = carry
    # lane-dense, vreg-aligned partial-sum output block for this grid step
    out_ref[0, 0, 0:8, :] = xe8
    out_ref[0, 0, 8:16, :] = in8
    out_ref[0, 0, 16:24, :] = p8
    out_ref[0, 0, 24:32, :] = t8


def xedice_loss(preds, targets, alpha=0.5, eps=1e-7):
    """preds: [N, C, H, W] float (f32 or bf16), targets: [N, H, W] int. Returns scalar."""
    N, C, H, W = preds.shape
    assert C >= 2, "dice term uses softmax class 1"
    HW = H * W
    r = pl.cdiv(HW, LANE)                    # rows of 128 pixels per image
    lane_pad = r * LANE - HW

    preds_flat = preds.reshape(N, C, HW)
    tgt_flat = targets.astype(jnp.int32).reshape(N, HW)
    if lane_pad:
        # TODO(synk): when HW % 128 != 0 this still costs one extra HBM pass over preds;
        # removing it requires an element-offset (pl.Element) index map on the pixel axis.
        preds_flat = jnp.pad(preds_flat, ((0, 0), (0, 0), (0, lane_pad)))
        tgt_flat = jnp.pad(tgt_flat, ((0, 0), (0, lane_pad)))
    preds4 = preds_flat.reshape(N, C, r, LANE)   # free contiguous split, no transpose
    tgt3 = tgt_flat.reshape(N, r, LANE)

    # Row-tile size: as large as the double-buffered-block VMEM budget allows,
    # a multiple of CHUNK_ROWS, never larger than the image's own row count.
    dsize = jnp.dtype(preds.dtype).itemsize
    bytes_per_row = LANE * (C * dsize + 4)                   # preds + int32 targets
    cap = (BLOCK_VMEM_BUDGET // (2 * bytes_per_row)) // CHUNK_ROWS * CHUNK_ROWS
    cap = max(CHUNK_ROWS, min(MAX_TILE_ROWS, cap))
    if r <= cap:
        tr, J = r, 1                # single tile covers the image exactly (no overhang)
    else:
        tr, J = cap, pl.cdiv(r, cap)  # last block may overhang -> masked in-kernel
    needs_mask = (lane_pad > 0) or (J * tr != r)

    kernel = functools.partial(
        _xedice_kernel, num_classes=C, chunk_rows=CHUNK_ROWS, tile_rows=tr,
        hw_valid=HW, needs_mask=needs_mask)

    block_bytes = 2 * tr * bytes_per_row + 2 * 32 * LANE * 4
    vmem_limit = int(min(48 * 1024 * 1024,
                         max(16 * 1024 * 1024, block_bytes + 8 * 1024 * 1024)))

    parts = pl.pallas_call(
        kernel,
        out_shape=jax.ShapeDtypeStruct((N, J, 32, LANE), jnp.float32),
        grid_spec=pltpu.PrefetchScalarGridSpec(
            num_scalar_prefetch=0,
            grid=(N, J),
            in_specs=[
                pl.BlockSpec((pl.Squeezed(), C, tr, LANE), lambda n, j: (n, 0, j, 0)),
                pl.BlockSpec((pl.Squeezed(), tr, LANE), lambda n, j: (n, j, 0)),
            ],
            out_specs=pl.BlockSpec((1, 1, 32, LANE), lambda n, j: (n, j, 0, 0)),
        ),
        compiler_params=pltpu.CompilerParams(
            dimension_semantics=("parallel", "parallel"),
            vmem_limit_bytes=vmem_limit,
        ),
    )(preds4, tgt3)

    # Tiny final combine (keeps grid axes "parallel" so v7x splits work across both TCs).
    sums = parts.reshape(N, J, 4, 8, LANE).sum(axis=(0, 1, 3, 4))
    xe_loss = sums[0] / float(N * HW)                  # CrossEntropyLoss(reduction='mean')
    dice_loss = 1.0 - 2.0 * sums[1] / (sums[2] + sums[3] + eps)
    return alpha * xe_loss + (1.0 - alpha) * dice_loss


def _reference(preds, targets, alpha=0.5, eps=1e-7):
    # pure-JAX reference mirroring torch semantics
    N, C, H, W = preds.shape
    logp = jax.nn.log_softmax(preds.astype(jnp.float32), axis=1)
    onehot = jax.nn.one_hot(targets, C, axis=1, dtype=jnp.float32)
    xe = -jnp.sum(onehot * logp, axis=1)               # [N, H, W]
    xe_loss = jnp.mean(xe)
    p1 = jax.nn.softmax(preds.astype(jnp.float32), axis=1)[:, 1]
    t1 = (targets == 1).astype(jnp.float32)
    inter = jnp.sum(p1 * t1)
    union = jnp.sum(p1) + jnp.sum(t1)
    dice = 1.0 - 2.0 * inter / (union + eps)
    return alpha * xe_loss + (1.0 - alpha) * dice


if __name__ == "__main__":
    key = jax.random.PRNGKey(0)
    kp, kt = jax.random.split(key)
    N, C, H, W = 2, 4, 16, 16
    preds = jax.random.normal(kp, (N, C, H, W), dtype=jnp.float32)
    targets = jax.random.randint(kt, (N, H, W), 0, C, dtype=jnp.int32)

    loss = jax.block_until_ready(xedice_loss(preds, targets))
    ref = jax.block_until_ready(_reference(preds, targets))
    assert jnp.allclose(loss, ref, atol=1e-5, rtol=1e-5), (loss, ref)
    print("KERNEL_OK")
</pallas_src>

<mosaic_0001>
module attributes {stable_mosaic.version = 11 : i64} {
  func.func @_xedice_kernel(%arg0: i32, %arg1: i32, %arg2: memref<1x4x2x128xf32, #tpu.memory_space<vmem>>, %arg3: memref<1x2x128xi32, #tpu.memory_space<vmem>>, %arg4: memref<1x1x32x128xf32, #tpu.memory_space<vmem>>) attributes {dimension_semantics = [#tpu.dimension_semantics<parallel>, #tpu.dimension_semantics<parallel>], iteration_bounds = array<i64: 2, 1>, scalar_prefetch = 0 : i64, scratch_operands = 0 : i64, tpu.core_type = #tpu.core_type<tc>, window_params = [{transform_indices = @transform_0, window_bounds = array<i64: 1, 4, 2, 128>}, {transform_indices = @transform_1, window_bounds = array<i64: 1, 2, 128>}, {transform_indices = @transform_2, window_bounds = array<i64: 1, 1, 32, 128>}]} {
    %cst = arith.constant 0.000000e+00 : f32
    %0 = vector.broadcast %cst : f32 to vector<8x128xf32>
    %c0 = arith.constant 0 : index
    %c0_0 = arith.constant 0 : index
    %c0_1 = arith.constant 0 : index
    %1 = vector.load %arg3[%c0, %c0_0, %c0_1] : memref<1x2x128xi32, #tpu.memory_space<vmem>>, vector<1x2x128xi32>
    %2 = vector.shape_cast %1 : vector<1x2x128xi32> to vector<2x128xi32>
    %c0_2 = arith.constant 0 : index
    %c0_3 = arith.constant 0 : index
    %c0_4 = arith.constant 0 : index
    %c0_5 = arith.constant 0 : index
    %3 = vector.load %arg2[%c0_2, %c0_3, %c0_4, %c0_5] : memref<1x4x2x128xf32, #tpu.memory_space<vmem>>, vector<1x1x2x128xf32>
    %4 = vector.shape_cast %3 : vector<1x1x2x128xf32> to vector<2x128xf32>
    %c0_6 = arith.constant 0 : index
    %c1 = arith.constant 1 : index
    %c0_7 = arith.constant 0 : index
    %c0_8 = arith.constant 0 : index
    %5 = vector.load %arg2[%c0_6, %c1, %c0_7, %c0_8] : memref<1x4x2x128xf32, #tpu.memory_space<vmem>>, vector<1x1x2x128xf32>
    %6 = vector.shape_cast %5 : vector<1x1x2x128xf32> to vector<2x128xf32>
    %7 = arith.maximumf %4, %6 : vector<2x128xf32>
    %c0_9 = arith.constant 0 : index
    %c2 = arith.constant 2 : index
    %c0_10 = arith.constant 0 : index
    %c0_11 = arith.constant 0 : index
    %8 = vector.load %arg2[%c0_9, %c2, %c0_10, %c0_11] : memref<1x4x2x128xf32, #tpu.memory_space<vmem>>, vector<1x1x2x128xf32>
    %9 = vector.shape_cast %8 : vector<1x1x2x128xf32> to vector<2x128xf32>
    %10 = arith.maximumf %7, %9 : vector<2x128xf32>
    %c0_12 = arith.constant 0 : index
    %c3 = arith.constant 3 : index
    %c0_13 = arith.constant 0 : index
    %c0_14 = arith.constant 0 : index
    %11 = vector.load %arg2[%c0_12, %c3, %c0_13, %c0_14] : memref<1x4x2x128xf32, #tpu.memory_space<vmem>>, vector<1x1x2x128xf32>
    %12 = vector.shape_cast %11 : vector<1x1x2x128xf32> to vector<2x128xf32>
    %13 = arith.maximumf %10, %12 : vector<2x128xf32>
    %14 = arith.subf %4, %13 : vector<2x128xf32>
    %15 = math.exp %14 : vector<2x128xf32>
    %c0_i32 = arith.constant 0 : i32
    %16 = vector.broadcast %c0_i32 : i32 to vector<2x128xi32>
    %17 = arith.cmpi eq, %2, %16 : vector<2x128xi32>
    %cst_15 = arith.constant 0.000000e+00 : f32
    %18 = vector.broadcast %cst_15 : f32 to vector<2x128xf32>
    %19 = arith.select %17, %4, %18 : vector<2x128xi1>, vector<2x128xf32>
    %c0_16 = arith.constant 0 : index
    %c1_17 = arith.constant 1 : index
    %c0_18 = arith.constant 0 : index
    %c0_19 = arith.constant 0 : index
    %20 = vector.load %arg2[%c0_16, %c1_17, %c0_18, %c0_19] : memref<1x4x2x128xf32, #tpu.memory_space<vmem>>, vector<1x1x2x128xf32>
    %21 = vector.shape_cast %20 : vector<1x1x2x128xf32> to vector<2x128xf32>
    %22 = arith.subf %21, %13 : vector<2x128xf32>
    %23 = math.exp %22 : vector<2x128xf32>
    %24 = arith.addf %15, %23 : vector<2x128xf32>
    %c1_i32 = arith.constant 1 : i32
    %25 = vector.broadcast %c1_i32 : i32 to vector<2x128xi32>
    %26 = arith.cmpi eq, %2, %25 : vector<2x128xi32>
    %cst_20 = arith.constant 0.000000e+00 : f32
    %27 = vector.broadcast %cst_20 : f32 to vector<2x128xf32>
    %28 = arith.select %26, %21, %27 : vector<2x128xi1>, vector<2x128xf32>
    %29 = arith.addf %19, %28 : vector<2x128xf32>
    %c0_21 = arith.constant 0 : index
    %c2_22 = arith.constant 2 : index
    %c0_23 = arith.constant 0 : index
    %c0_24 = arith.constant 0 : index
    %30 = vector.load %arg2[%c0_21, %c2_22, %c0_23, %c0_24] : memref<1x4x2x128xf32, #tpu.memory_space<vmem>>, vector<1x1x2x128xf32>
    %31 = vector.shape_cast %30 : vector<1x1x2x128xf32> to vector<2x128xf32>
    %32 = arith.subf %31, %13 : vector<2x128xf32>
    %33 = math.exp %32 : vector<2x128xf32>
    %34 = arith.addf %24, %33 : vector<2x128xf32>
    %c2_i32 = arith.constant 2 : i32
    %35 = vector.broadcast %c2_i32 : i32 to vector<2x128xi32>
    %36 = arith.cmpi eq, %2, %35 : vector<2x128xi32>
    %cst_25 = arith.constant 0.000000e+00 : f32
    %37 = vector.broadcast %cst_25 : f32 to vector<2x128xf32>
    %38 = arith.select %36, %31, %37 : vector<2x128xi1>, vector<2x128xf32>
    %39 = arith.addf %29, %38 : vector<2x128xf32>
    %c0_26 = arith.constant 0 : index
    %c3_27 = arith.constant 3 : index
    %c0_28 = arith.constant 0 : index
    %c0_29 = arith.constant 0 : index
    %40 = vector.load %arg2[%c0_26, %c3_27, %c0_28, %c0_29] : memref<1x4x2x128xf32, #tpu.memory_space<vmem>>, vector<1x1x2x128xf32>
    %41 = vector.shape_cast %40 : vector<1x1x2x128xf32> to vector<2x128xf32>
    %42 = arith.subf %41, %13 : vector<2x128xf32>
    %43 = math.exp %42 : vector<2x128xf32>
    %44 = arith.addf %34, %43 : vector<2x128xf32>
    %c3_i32 = arith.constant 3 : i32
    %45 = vector.broadcast %c3_i32 : i32 to vector<2x128xi32>
    %46 = arith.cmpi eq, %2, %45 : vector<2x128xi32>
    %cst_30 = arith.constant 0.000000e+00 : f32
    %47 = vector.broadcast %cst_30 : f32 to vector<2x128xf32>
    %48 = arith.select %46, %41, %47 : vector<2x128xi1>, vector<2x128xf32>
    %49 = arith.addf %39, %48 : vector<2x128xf32>
    %50 = math.log %44 : vector<2x128xf32>
    %51 = arith.addf %13, %50 : vector<2x128xf32>
    %52 = arith.subf %51, %49 : vector<2x128xf32>
    %53 = arith.divf %23, %44 : vector<2x128xf32>
    %c1_i32_31 = arith.constant 1 : i32
    %54 = vector.broadcast %c1_i32_31 : i32 to vector<2x128xi32>
    %55 = arith.cmpi eq, %2, %54 : vector<2x128xi32>
    %56 = arith.extui %55 : vector<2x128xi1> to vector<2x128xi32>
    %57 = arith.sitofp %56 : vector<2x128xi32> to vector<2x128xf32>
    %cst_32 = arith.constant 0.000000e+00 : f32
    %58 = vector.broadcast %cst_32 : f32 to vector<6x128xf32>
    %59 = tpu.concatenate %52, %58 in 0 : vector<2x128xf32>, vector<6x128xf32> -> vector<8x128xf32>
    %60 = arith.addf %0, %59 : vector<8x128xf32>
    %61 = arith.mulf %53, %57 : vector<2x128xf32>
    %cst_33 = arith.constant 0.000000e+00 : f32
    %62 = vector.broadcast %cst_33 : f32 to vector<6x128xf32>
    %63 = tpu.concatenate %61, %62 in 0 : vector<2x128xf32>, vector<6x128xf32> -> vector<8x128xf32>
    %64 = arith.addf %0, %63 : vector<8x128xf32>
    %cst_34 = arith.constant 0.000000e+00 : f32
    %65 = vector.broadcast %cst_34 : f32 to vector<6x128xf32>
    %66 = tpu.concatenate %53, %65 in 0 : vector<2x128xf32>, vector<6x128xf32> -> vector<8x128xf32>
    %67 = arith.addf %0, %66 : vector<8x128xf32>
    %cst_35 = arith.constant 0.000000e+00 : f32
    %68 = vector.broadcast %cst_35 : f32 to vector<6x128xf32>
    %69 = tpu.concatenate %57, %68 in 0 : vector<2x128xf32>, vector<6x128xf32> -> vector<8x128xf32>
    %70 = arith.addf %0, %69 : vector<8x128xf32>
    %c0_36 = arith.constant 0 : index
    %c0_37 = arith.constant 0 : index
    %c0_38 = arith.constant 0 : index
    %c0_39 = arith.constant 0 : index
    %71 = vector.load %arg4[%c0_36, %c0_37, %c0_38, %c0_39] : memref<1x1x32x128xf32, #tpu.memory_space<vmem>>, vector<1x1x8x128xf32>
    %72 = vector.shape_cast %71 : vector<1x1x8x128xf32> to vector<8x128xf32>
    %73 = vector.shape_cast %60 : vector<8x128xf32> to vector<1x1x8x128xf32>
    tpu.vector_store %arg4[%c0_36, %c0_37, %c0_38, %c0_39], %73 {strides = array<i32>} : memref<1x1x32x128xf32, #tpu.memory_space<vmem>>, vector<1x1x8x128xf32>,
    %c0_40 = arith.constant 0 : index
    %c0_41 = arith.constant 0 : index
    %c8 = arith.constant 8 : index
    %c0_42 = arith.constant 0 : index
    %74 = vector.load %arg4[%c0_40, %c0_41, %c8, %c0_42] : memref<1x1x32x128xf32, #tpu.memory_space<vmem>>, vector<1x1x8x128xf32>
    %75 = vector.shape_cast %74 : vector<1x1x8x128xf32> to vector<8x128xf32>
    %76 = vector.shape_cast %64 : vector<8x128xf32> to vector<1x1x8x128xf32>
    tpu.vector_store %arg4[%c0_40, %c0_41, %c8, %c0_42], %76 {strides = array<i32>} : memref<1x1x32x128xf32, #tpu.memory_space<vmem>>, vector<1x1x8x128xf32>,
    %c0_43 = arith.constant 0 : index
    %c0_44 = arith.constant 0 : index
    %c16 = arith.constant 16 : index
    %c0_45 = arith.constant 0 : index
    %77 = vector.load %arg4[%c0_43, %c0_44, %c16, %c0_45] : memref<1x1x32x128xf32, #tpu.memory_space<vmem>>, vector<1x1x8x128xf32>
    %78 = vector.shape_cast %77 : vector<1x1x8x128xf32> to vector<8x128xf32>
    %79 = vector.shape_cast %67 : vector<8x128xf32> to vector<1x1x8x128xf32>
    tpu.vector_store %arg4[%c0_43, %c0_44, %c16, %c0_45], %79 {strides = array<i32>} : memref<1x1x32x128xf32, #tpu.memory_space<vmem>>, vector<1x1x8x128xf32>,
    %c0_46 = arith.constant 0 : index
    %c0_47 = arith.constant 0 : index
    %c24 = arith.constant 24 : index
    %c0_48 = arith.constant 0 : index
    %80 = vector.load %arg4[%c0_46, %c0_47, %c24, %c0_48] : memref<1x1x32x128xf32, #tpu.memory_space<vmem>>, vector<1x1x8x128xf32>
    %81 = vector.shape_cast %80 : vector<1x1x8x128xf32> to vector<8x128xf32>
    %82 = vector.shape_cast %70 : vector<8x128xf32> to vector<1x1x8x128xf32>
    tpu.vector_store %arg4[%c0_46, %c0_47, %c24, %c0_48], %82 {strides = array<i32>} : memref<1x1x32x128xf32, #tpu.memory_space<vmem>>, vector<1x1x8x128xf32>,
    return
  }
  func.func @transform_0(%arg0: i32, %arg1: i32) -> (i32, i32, i32, i32) {
    %c0_i32 = arith.constant 0 : i32
    %c0_i32_0 = arith.constant 0 : i32
    %c0_i32_1 = arith.constant 0 : i32
    return %arg0, %c0_i32, %arg1, %c0_i32_0 : i32, i32, i32, i32
  }
  func.func @transform_1(%arg0: i32, %arg1: i32) -> (i32, i32, i32) {
    %c0_i32 = arith.constant 0 : i32
    %c0_i32_0 = arith.constant 0 : i32
    return %arg0, %arg1, %c0_i32 : i32, i32, i32
  }
  func.func @transform_2(%arg0: i32, %arg1: i32) -> (i32, i32, i32, i32) {
    %c0_i32 = arith.constant 0 : i32
    %c0_i32_0 = arith.constant 0 : i32
    %c0_i32_1 = arith.constant 0 : i32
    return %arg0, %arg1, %c0_i32, %c0_i32_0 : i32, i32, i32, i32
  }
}

</mosaic_0001>

<bundles_post_ra>
// kernel: tpu_custom_call.1
= control target key start
LH: loop header
LB: loop body
LE: loop exit
PB: predicated region body
PF: predicated region fallthrough
CT: control target
= control target key end

     0   :  { %7 = vsyncpa [#allocation3], 0  ;;  %s867_s0 = inlined_call_operand.hbm [shape: f32[2,4,2,128], index: 0, kind: input, shape index: {}]   ;;  %s868_s1 = inlined_call_operand.hbm [shape: s32[2,2,128], index: 1, kind: input, shape index: {}]   ;;  %s869_s2 = inlined_call_operand.hbm [shape: f32[2,1,32,128], index: 2, kind: output, shape index: {}]  }
   0x1   :  { %9 = vsyncpa [#allocation3 + $0x1], 0 }
   0x2   :  { %10 = vsyncpa [#allocation6], 0 }
   0x3   :  { %12 = vsyncpa [#allocation6 + $0x1], 0 }
   0x4   :  { %13 = vsyncpa [#allocation4], 0 }
   0x5   :  { %15 = vsyncpa [#allocation4 + $0x1], 0  ;;  %s677_s9 = smov 0   ;;  %s679_s10 = smov 0  }
   0x6   :  { %s681_s11 = smov 0   ;;  %s683_s12 = smov 0  }
   0x7   :  { %s685_s13 = smov 0   ;;  %s687_s14 = smov 0  }
   0x8 LB: > { %s404_s15 = sadd.s32 4294967295, %s652_s14   ;;  %s405_s16 = sadd.s32 4294967294, %s652_s14   ;;  %s652_s14 = sphi %s687_s14, %s21_s14   ;;  %s648_s13 = sphi %s685_s13, %s880_s13   ;;  %s644_s12 = sphi %s683_s12, %s879_s12   ;;  %s640_s11 = sphi %s681_s11, %s878_s11   ;;  %s636_s10 = sphi %s679_s10, %s877_s10   ;;  %s632_s9 = sphi %s677_s9, %s876_s9  }
   0x9   : > { %s33_s17 = sadd.s32 1, %s648_s13  ;;  %s42_s18 = sadd.s32 1, %s640_s11 }
   0xa   : > { %p35_p0 = scmp.ge.s32.totalorder %s33_s17, 2  ;;  %p49_p1 = scmp.ne.s32.totalorder %s640_s11, %s636_s10 }
   0xb   : > { %p50_p2 = scmp.eq.s32.totalorder %s652_s14, 0  ;;  %p55_p3 = scmp.ne.s32.totalorder %s636_s10, %s632_s9 }
   0xc   : > { %s882_s17 = smov (%p35_p0, %s33_s17), 0  ;;  %p56_p5 = scmp.eq.s32.totalorder %s404_s15, 0 }
   0xd   : > { %p718_p4 = por %p50_p2, %p49_p1  ;;  %s37_s20 = ssub.s32 %s648_s13, %s882_s17 }
   0xe   : > { %p109_p6 = scmp.eq.s32.totalorder %s404_s15, 1  ;;  %p40_p7 = scmp.eq.s32.totalorder %s37_s20, 0 }
   0xf   : > { %p724_p8 = por %p56_p5, %p55_p3  ;;  %p115_p10 = scmp.eq.s32.totalorder %s405_s16, 1 }
  0x10   : > { %p728_p9 = por %p109_p6, %p49_p1  ;;  %p407_p12 = scmp.ge.s32.totalorder %s652_s14, 2 }
  0x11   : > { %s733_s23 = scalar_select %p40_p7, %s640_s11, %s42_s18  }
  0x12   : > { %p735_p11 = por %p115_p10, %p55_p3  ;;  %p445_p13 = scmp.lt.s32.totalorder %s652_s14, 2 }
  0x13   : > { %s742_s25 = sand.u32 1, %s640_s11   ;;  %s426_s27 = sshll.u32 %s648_s13, 7 }
  0x14   : > { %s408_s26 = sshll.u32 %s742_s25, 3  ;;  %s146_s30 = scalar_lea.hbm %s867_s0, %s426_s27 }
  0x15   : > { %s139_s3 = scalar_lea.vmem [#allocation2], %s408_s26  ;;  %p751_p0 = pnand %p445_p13, %p718_p4 }
  0x16   : > { %s147_s4 = sshll.u32 %s139_s3, 4  ;;  %p413_p1 = scmp.ge.s32.totalorder %s652_s14, 1  ;;  %s148_s4 = int_to_ptr.vmem [resolvable:$true] %s147_s4 }
  0x17   : > { %s136_s6 = scalar_lea.sflag [#allocation3], %s742_s25  ;;  %p514_p2 = pneg %p751_p0 }
  0x18   : > { %s525_s7 = scalar_lea.vmem %s148_s4, 128  ;;  %s654_s8 = smov [#allocation2]  }
  0x19   : > { %p526_p3 = scmp.ne.s32.totalorder %s148_s4, %s525_s7  ;;  %s530_s15 = sshll.u32 %s654_s8, 4  ;;  %s531_s15 = int_to_ptr.vmem [resolvable:$false] %s530_s15 }
  0x1a   : > { %s532_s16 = scalar_lea.vmem %s531_s15, 256  ;;  %p533_p4 = scmp.lt.s32.totalorder %s148_s4, %s531_s15 }
  0x1b   : > { %p528_p5 = pnand %p526_p3, %p514_p2  ;;  %p534_p7 = scmp.lt.s32.totalorder %s532_s16, %s525_s7 }
  0x1d   : > { %p529_p6 = pneg %p528_p5  ;;  %p535_p10 = por %p534_p7, %p533_p4 }
  0x1f   : > { %p536_p13 = pnand %p535_p10, %p529_p6 }
  0x21   : > { %539 = shalt.err (!%p536_p13)
}
  0x22   : > { %s655_s18 = smov 32   ;;  %s656_s19 = smov 2  }
  0x23   : > { %437 = dma.hbm_to_vmem [thread:$0]  (!%p751_p0), %s146_s30, 128, %s148_s4, %s136_s6, %s655_s18, %s655_s18, %s656_s19  }
  0x24   : > { %p174_p3 = scmp.lt.s32.totalorder %s652_s14, 3  ;;  %s411_s20 = sshll.u32 %s742_s25, 1 }
  0x25   : > { %s412_s26 = sshll.u32 %s648_s13, 5  ;;  %s161_s7 = scalar_lea.vmem [#allocation5], %s411_s20 }
  0x26   : > { %p769_p5 = pnand %p413_p1, %p174_p3  ;;  %s167_s3 = scalar_lea.hbm %s868_s1, %s412_s26 }
  0x27   : > { %s169_s8 = sshll.u32 %s161_s7, 4  ;;  %s158_s15 = scalar_lea.sflag [#allocation6], %s742_s25  ;;  %s170_s8 = int_to_ptr.vmem [resolvable:$true] %s169_s8 }
  0x28   : > { %s553_s16 = scalar_lea.vmem %s170_s8, 32  ;;  %s657_s30 = smov [#allocation5]  }
  0x29   : > { %p554_p6 = scmp.ne.s32.totalorder %s170_s8, %s553_s16  ;;  %s558_s4 = sshll.u32 %s657_s30, 4  ;;  %s559_s4 = int_to_ptr.vmem [resolvable:$false] %s558_s4 }
  0x2a   : > { %s560_s6 = scalar_lea.vmem %s559_s4, 64  ;;  %p561_p1 = scmp.lt.s32.totalorder %s170_s8, %s559_s4 }
  0x2b   : > { %p556_p4 = pnand %p554_p6, %p514_p2  ;;  %p562_p10 = scmp.lt.s32.totalorder %s560_s6, %s553_s16 }
  0x2d   : > { %p557_p7 = pneg %p556_p4  ;;  %p563_p13 = por %p562_p10, %p561_p1 }
  0x2f   : > { %p564_p3 = pnand %p563_p13, %p557_p7 }
  0x31   : > { %567 = shalt.err (!%p564_p3)
}
  0x32   : > { %440 = dma.hbm_to_vmem [thread:$0]  (!%p751_p0), %s167_s3, 32, %s170_s8, %s158_s15  }
  0x33   : > { %178 = sbr.rel (%p769_p5) target bundleno = 128 (0x80), region = 28  ;;  %s785_s25 = sand.u32 (!%p769_p5), 1, %s636_s10  }
  0x34   : > { %s414_s18 = sshll.u32 (!%p769_p5), %s785_s25, 3  ;;  %s181_s19 = scalar_lea.sflag (!%p769_p5), [#allocation3], %s785_s25 }
  0x35   : > { %s184_s20 = scalar_lea.vmem (!%p769_p5), [#allocation2], %s414_s18 }
  0x38   : > { %619 = dma.done.wait (%p724_p8), %s181_s19, 128  }
  0x39   : > { %621 = vsyncadd (%p724_p8), %s181_s19, 4294967168  ;;  %s415_s5 = sshll.u32 %s785_s25, 1  ;;  %s190_s26 = scalar_lea.sflag [#allocation6], %s785_s25 }
  0x3a   : > { %s193_s27 = scalar_lea.vmem [#allocation5], %s415_s5 }
  0x3b   : > { %623 = dma.done.wait (%p724_p8), %s190_s26, 32  }
  0x3c   : > { %625 = vsyncadd (%p724_p8), %s190_s26, 4294967264  ;;  %s416_s28 = sshll.u32 %s785_s25, 5  ;;  %v219_v0 = vld [vmem:[%s193_s27] sm:$0x3]  ;;  %v220_v1 = vld [vmem:[%s184_s20] sm:$0x3] }
  0x3d   : > { %v417_v2 = vld [vmem:[%s184_s20 + $0x2] sm:$0x3]  ;;  %v418_v4 = vld [vmem:[%s184_s20 + $0x4] sm:$0x3]  ;;  %v419_v5 = vld [vmem:[%s184_s20 + $0x6] sm:$0x3] }
  0x3e   : > { %v223_v3 = vmax.f32 %v220_v1, %v417_v2  ;;  %vm264_vm0 = vcmask 1041408   ;;  %vm239_vm1 = vcmp.eq.s32.totalorder %v219_v0, 1  ;;  %v658_v7 = vmov 0.0   ;;  %s802_s29 = scalar_lea.vmem [#allocation7], %s416_s28  ;;  %s427_s3 = sshll.u32 %s644_s12, 9 }
  0x3f   : > { %v420_v8 = vsel %vm239_vm1, 1.0, %v658_v7  ;;  %vm233_vm2 = vcmp.eq.s32.totalorder %v219_v0, 0  ;;  %v240_v27 = vsel %vm239_vm1, %v417_v2, 0.0  ;;  %vm246_vm3 = vcmp.eq.s32.totalorder %v219_v0, 2  ;;  %s294_s21 = sshll.u32 %s802_s29, 4  ;;  %s815_s15 = scalar_lea.hbm %s869_s2, %s427_s3  ;;  %s809_s21 = int_to_ptr.vmem [resolvable:$true] %s294_s21 }
  0x40   : > { %v226_v6 = vmax.f32 %v223_v3, %v418_v4  ;;  %v272_v10 = vsel %vm264_vm0, %v420_v8, 0.0  ;;  %v234_v26 = vsel %vm233_vm2, %v220_v1, 0.0  ;;  %v247_v29 = vsel %vm246_vm3, %v418_v4, 0.0  ;;  %s279_s12 = scalar_lea.sflag [#allocation4], %s785_s25  ;;  %s568_s16 = scalar_lea.vmem %s809_s21, 512 }
  0x41   : > { %277 = vst [vmem:[%s802_s29 + $0x18] sm:$0xff] %v272_v10  ;;  %v241_v28 = vadd.f32 %v240_v27, %v234_v26  ;;  %vm253_vm4 = vcmp.eq.s32.totalorder %v219_v0, 3  ;;  %p569_p8 = scmp.ne.s32.totalorder %s809_s21, %s568_s16  ;;  %s659_s30 = smov [#allocation7]  }
  0x42   : > { %v229_v9 = vmax.f32 %v226_v6, %v419_v5  ;;  %v254_v31 = vsel %vm253_vm4, %v419_v5, 0.0  ;;  %s572_s4 = sshll.u32 %s659_s30, 4  ;;  %s573_s4 = int_to_ptr.vmem [resolvable:$false] %s572_s4 }
  0x43   : > { %v248_v30 = vadd.f32 %v247_v29, %v241_v28  ;;  %p570_p0 = pnand %p569_p8, %p728_p9  ;;  %s574_s6 = scalar_lea.vmem %s573_s4, 1024 }
  0x44   : > { %v230_v11 = vsub.f32 %v220_v1, %v229_v9  ;;  %v235_v12 = vsub.f32 %v417_v2, %v229_v9  ;;  %v242_v13 = vsub.f32 %v418_v4, %v229_v9  ;;  %v249_v14 = vsub.f32 %v419_v5, %v229_v9  ;;  %p575_p5 = scmp.lt.s32.totalorder %s809_s21, %s573_s4  ;;  %p576_p6 = scmp.lt.s32.totalorder %s574_s6, %s568_s16 }
  0x45   : > { %v255_v34 = vadd.f32 %v254_v31, %v248_v30  ;;  %p571_p2 = pneg %p570_p0 }
  0x46   : > { %v231_v15 = vmul.f32 1.442695, %v230_v11  ;;  %v236_v16 = vmul.f32 1.442695, %v235_v12  ;;  %v243_v17 = vmul.f32 1.442695, %v242_v13  ;;  %p577_p4 = por %p576_p6, %p575_p5 }
  0x47   : > { %v250_v18 = vmul.f32 1.442695, %v249_v14 }
  0x48   : > { %500 = vpow2.f32 %v231_v15  ;;  %p578_p7 = pnand %p577_p4, %p571_p2 }
  0x49   : > { %502 = vpow2.f32 %v236_v16 }
  0x4a   : > { %504 = vpow2.f32 %v243_v17 }
  0x4b   : > { %506 = vpow2.f32 %v250_v18 }
  0x55   : > { %v501_v19 = vpop.eup %500 }
  0x56   : > { %v503_v20 = vpop.eup %502 }
  0x57   : > { %v505_v21 = vpop.eup %504  ;;  %v238_v22 = vadd.f32 %v503_v20, %v501_v19 }
  0x58   : > { %v507_v23 = vpop.eup %506 }
  0x59   : > { %v245_v24 = vadd.f32 %v505_v21, %v238_v22 }
  0x5b   : > { %v252_v25 = vadd.f32 %v507_v23, %v245_v24 }
  0x5d   : > { %508 = vlog2.f32 %v252_v25 }
  0x5e   : > { %510 = vrcp.f32 %v252_v25 }
  0x6a   : > { %v509_v32 = vpop.eup %508 }
  0x6b   : > { %v511_v33 = vpop.eup %510  ;;  %v257_v35 = vmul.f32 0.6931472, %v509_v32 }
  0x6c   : > { %v261_v36 = vmul.f32 %v511_v33, %v503_v20 }
  0x6d   : > { %v258_v37 = vadd.f32 %v257_v35, %v229_v9 }
  0x6e   : > { %v267_v38 = vmul.f32 %v420_v8, %v261_v36  ;;  %v270_v39 = vsel %vm264_vm0, %v261_v36, 0.0 }
  0x6f   : > { %v259_v40 = vsub.f32 %v258_v37, %v255_v34  ;;  %276 = vst [vmem:[%s802_s29 + $0x10] sm:$0xff] %v270_v39 }
  0x70   : > { %v268_v41 = vsel %vm264_vm0, %v267_v38, 0.0 }
  0x71   : > { %v265_v42 = vsel %vm264_vm0, %v259_v40, 0.0  ;;  %275 = vst [vmem:[%s802_s29 + $0x8] sm:$0xff] %v268_v41 }
  0x72   : > { %274 = vst [vmem:[%s802_s29] sm:$0xff] %v265_v42 }
  0x73   : > { %581 = shalt.err (!%p578_p7)
}
  0x74   : > { %s582_s18 = scalar_lea.hbm %s815_s15, 512  ;;  %s586_s5 = scalar_lea.hbm %s869_s2, 1024 }
  0x75   : > { %p583_p1 = scmp.ne.s32.totalorder %s815_s15, %s582_s18  ;;  %p587_p3 = scmp.lt.s32.totalorder %s815_s15, %s869_s2 }
  0x76   : > { %p588_p8 = scmp.lt.s32.totalorder %s586_s5, %s582_s18 }
  0x77   : > { %p584_p10 = pnand %p583_p1, %p728_p9 }
  0x78   : > { %p589_p0 = por %p588_p8, %p587_p3 }
  0x79   : > { %p585_p13 = pneg %p584_p10 }
  0x7b   : > { %p590_p2 = pnand %p589_p0, %p585_p13 }
  0x7d   : > { %593 = shalt.err (!%p590_p2)
}
  0x7e   : > { %s660_s28 = smov 128   ;;  %s661_s29 = smov 8  }
  0x7f   : > { %432 = dma.vmem_to_hbm [thread:$0]  (%p728_p9), %s809_s21, 512, %s815_s15, %s279_s12, %s660_s28, %s660_s28, %s661_s29  }
  0x80 PF: > { %s309_s3 = sand.u32 1, %s632_s9   ;;  %p442_p5 = pnand %p407_p12, %p735_p11 }
  0x81   : > { %s310_s7 = scalar_lea.sflag [#allocation4], %s309_s3 }
  0x82   : > { %p443_p6 = pneg %p442_p5 }
  0x84   : > { %627 = dma.done.wait (%p443_p6), %s310_s7, 512  }
  0x85   : > { %629 = vsyncadd (%p443_p6), %s310_s7, 4294966784  ;;  %s21_s14 = sadd.s32 1, %s652_s14   ;;  %s876_s9 = smov %s636_s10 }
  0x86   : > { %p18_p4 = scmp.ge.s32.totalorder %s21_s14, 4   ;;  %s877_s10 = smov %s640_s11 }
  0x87   : > { %s878_s11 = smov %s733_s23  ;;  %s879_s12 = smov %s648_s13 }
  0x88   : > { %s880_s13 = smov %s882_s17  ;;  %20 = sbr.rel (!%p18_p4) target bundleno = 8 (0x8), region = 89 }
  0x8d   :  { %315 = vsyncpa [#allocation3], 1 }
  0x8e   :  { %317 = vsyncpa [#allocation3 + $0x1], 1 }
  0x8f   :  { %318 = vsyncpa [#allocation6], 1 }
  0x90   :  { %320 = vsyncpa [#allocation6 + $0x1], 1 }
  0x91   :  { %321 = vsyncpa [#allocation4], 1 }
  0x92   :  { %323 = vsyncpa [#allocation4 + $0x1], 1 }

</bundles_post_ra>
